<compile_context>
chip_gen: v7x
topology: tpu7x:2x2x1
jax: 0.10.0
libtpu: 0.0.40
codegen_flags: <defaults>
</compile_context>

<pallas_src>
import jax
import jax.numpy as jnp
from jax.experimental import pallas as pl
from jax.experimental.pallas import tpu as pltpu

_MAX_TILE_P = 8 * 1024  # lane tile for flattened pixels (f32 out block = 256 KiB)


def _fused_conv_kernel(x_ref, m_ref, w_eff_ref, b_eff_ref, b2_ref, o_ref):
    """Fused conv1->conv2 pointwise kernel (pure VPU).

    x_ref:     (1, T)  zero-padded (by 2) input pixels, flattened
    m_ref:     (1, T)  1.0 for pixels NOT on the outermost output ring, else 0.0
    w_eff_ref: (8, 1)  folded weights  w2 @ w1
    b_eff_ref: (8, 1)  folded bias     w2 @ b1 + b2
    b2_ref:    (8, 1)  conv2 bias (value of the outermost ring)
    o_ref:     (8, T)  channels-first output pixels (NCHW-compatible)
    """
    bias = jnp.where(m_ref[...] > 0.5, b_eff_ref[...], b2_ref[...])   # (8, T)
    o_ref[...] = w_eff_ref[...] * x_ref[...] + bias


def fused_conv1x1_pair(x_pad_flat, inner_mask, w_eff, b_eff, b2):
    """x_pad_flat: (N, 1, M) f32; inner_mask: (1, M) f32; params: (Cout, 1) f32."""
    N, _, M = x_pad_flat.shape
    Cout = w_eff.shape[0]
    # Full flattened-pixel block when small (single step), else 128-aligned tiles.
    tile_p = M if M <= _MAX_TILE_P else _MAX_TILE_P
    grid = (N, pl.cdiv(M, tile_p))
    return pl.pallas_call(
        _fused_conv_kernel,
        out_shape=jax.ShapeDtypeStruct((N, Cout, M), jnp.float32),
        grid=grid,
        in_specs=[
            pl.BlockSpec((None, 1, tile_p), lambda n, t: (n, 0, t)),
            pl.BlockSpec((1, tile_p), lambda n, t: (0, t)),
            pl.BlockSpec((Cout, 1), lambda n, t: (0, 0)),
            pl.BlockSpec((Cout, 1), lambda n, t: (0, 0)),
            pl.BlockSpec((Cout, 1), lambda n, t: (0, 0)),
        ],
        out_specs=pl.BlockSpec((None, Cout, tile_p), lambda n, t: (n, 0, t)),
        compiler_params=pltpu.CompilerParams(
            dimension_semantics=("parallel", "parallel")),
    )(x_pad_flat, inner_mask, w_eff, b_eff, b2)


@jax.jit
def model_forward(x_nchw, params):
    """Equivalent of Model.forward(x): conv1 (1->8, k=1, p=1) then conv2 (8->8, k=1, p=1)."""
    w1, b1, w2, b2 = params            # (8,1,1,1), (8,), (8,8,1,1), (8,)
    N, Cin, H, W = x_nchw.shape
    assert Cin == 1, "Model is defined for a single input channel"
    Cout = w2.shape[0]
    Hout, Wout = H + 4, W + 4
    M = Hout * Wout

    # Fold the two affine pointwise convs (tiny 8x8 weight preprocessing).
    w1v = w1.reshape(Cout, 1)                      # per-channel scalar (Cin = 1)
    w2m = w2.reshape(Cout, Cout)
    w_eff = (w2m @ w1v).reshape(Cout, 1)
    b_eff = w2m @ b1.reshape(Cout, 1) + b2.reshape(Cout, 1)
    b2c = b2.reshape(Cout, 1)

    # Zero-pad the single-channel input by 2 -> aligns with conv2's output grid.
    # TODO(synk): the 2-pixel zero pad stays as a (tiny) wrapper-side jnp.pad;
    # doing it in-kernel would need unaligned lane shifts for no measurable gain.
    xp = jnp.pad(x_nchw[:, 0, :, :], ((0, 0), (2, 2), (2, 2)))
    xp_flat = xp.reshape(N, 1, M)

    # 1.0 everywhere except the outermost output ring (that ring is exactly b2).
    inner = jnp.pad(jnp.ones((Hout - 2, Wout - 2), jnp.float32), ((1, 1), (1, 1)))
    inner = inner.reshape(1, M)

    out_flat = fused_conv1x1_pair(xp_flat, inner, w_eff, b_eff, b2c)
    return out_flat.reshape(N, Cout, Hout, Wout)   # already NCHW: free reshape


def ref_forward(x_nchw, params):
    """Pure-JAX reference: the literal two-conv computation (PyTorch semantics)."""
    w1, b1, w2, b2 = params
    Cmid, Cout = w1.shape[0], w2.shape[0]
    xp = jnp.pad(x_nchw, ((0, 0), (0, 0), (1, 1), (1, 1)))
    v1 = jnp.einsum("oi,nihw->nohw", w1.reshape(Cmid, -1), xp) + b1[None, :, None, None]
    v1p = jnp.pad(v1, ((0, 0), (0, 0), (1, 1), (1, 1)))
    v2 = jnp.einsum("oi,nihw->nohw", w2.reshape(Cout, Cmid), v1p) + b2[None, :, None, None]
    return v2


if __name__ == "__main__":
    key = jax.random.PRNGKey(0)
    k_x, k_w1, k_b1, k_w2, k_b2 = jax.random.split(key, 5)

    # Shapes consistent with the spec: x1 = torch.randn(1, 1, 64, 64).
    N, Cin, H, W = 1, 1, 64, 64
    Cmid, Cout = 8, 8

    x = jax.random.normal(k_x, (N, Cin, H, W), dtype=jnp.float32)
    w1 = jax.random.normal(k_w1, (Cmid, Cin, 1, 1), dtype=jnp.float32) * 0.5
    b1 = jax.random.normal(k_b1, (Cmid,), dtype=jnp.float32) * 0.1
    w2 = jax.random.normal(k_w2, (Cout, Cmid, 1, 1), dtype=jnp.float32) * 0.5
    b2 = jax.random.normal(k_b2, (Cout,), dtype=jnp.float32) * 0.1
    params = (w1, b1, w2, b2)

    out = jax.block_until_ready(model_forward(x, params))
    ref = ref_forward(x, params)

    assert out.shape == (N, Cout, H + 4, W + 4), out.shape
    assert jnp.allclose(out, ref, atol=1e-4, rtol=1e-4), float(jnp.max(jnp.abs(out - ref)))

    print("KERNEL_OK")
</pallas_src>

<mosaic_0001>
module attributes {stable_mosaic.version = 11 : i64} {
  func.func @_fused_conv_kernel(%arg0: i32, %arg1: i32, %arg2: memref<1x1x4624xf32, #tpu.memory_space<vmem>>, %arg3: memref<1x4624xf32, #tpu.memory_space<vmem>>, %arg4: memref<8x1xf32, #tpu.memory_space<vmem>>, %arg5: memref<8x1xf32, #tpu.memory_space<vmem>>, %arg6: memref<8x1xf32, #tpu.memory_space<vmem>>, %arg7: memref<1x8x4624xf32, #tpu.memory_space<vmem>>) attributes {dimension_semantics = [#tpu.dimension_semantics<parallel>, #tpu.dimension_semantics<parallel>], iteration_bounds = array<i64: 1, 1>, scalar_prefetch = 0 : i64, scratch_operands = 0 : i64, tpu.core_type = #tpu.core_type<tc>, window_params = [{transform_indices = @transform_0, window_bounds = array<i64: 1, 1, 4624>}, {transform_indices = @transform_1, window_bounds = array<i64: 1, 4624>}, {pipeline_mode = #tpu.pipeline_mode<synchronous>, transform_indices = @transform_2, window_bounds = array<i64: 8, 1>}, {pipeline_mode = #tpu.pipeline_mode<synchronous>, transform_indices = @transform_3, window_bounds = array<i64: 8, 1>}, {pipeline_mode = #tpu.pipeline_mode<synchronous>, transform_indices = @transform_4, window_bounds = array<i64: 8, 1>}, {transform_indices = @transform_5, window_bounds = array<i64: 1, 8, 4624>}]} {
    %c0 = arith.constant 0 : index
    %c0_0 = arith.constant 0 : index
    %0 = vector.load %arg3[%c0, %c0_0] : memref<1x4624xf32, #tpu.memory_space<vmem>>, vector<1x4624xf32>
    %cst = arith.constant 5.000000e-01 : f32
    %1 = vector.broadcast %cst : f32 to vector<1x4624xf32>
    %2 = arith.cmpf ogt, %0, %1 : vector<1x4624xf32>
    %c0_1 = arith.constant 0 : index
    %c0_2 = arith.constant 0 : index
    %3 = vector.load %arg5[%c0_1, %c0_2] : memref<8x1xf32, #tpu.memory_space<vmem>>, vector<8x1xf32>
    %c0_3 = arith.constant 0 : index
    %c0_4 = arith.constant 0 : index
    %4 = vector.load %arg6[%c0_3, %c0_4] : memref<8x1xf32, #tpu.memory_space<vmem>>, vector<8x1xf32>
    %5 = vector.shape_cast %2 : vector<1x4624xi1> to vector<1x4624xi1>
    %6 = vector.broadcast %5 : vector<1x4624xi1> to vector<8x4624xi1>
    %7 = vector.shape_cast %3 : vector<8x1xf32> to vector<8x1xf32>
    %8 = vector.broadcast %7 : vector<8x1xf32> to vector<8x4624xf32>
    %9 = vector.shape_cast %4 : vector<8x1xf32> to vector<8x1xf32>
    %10 = vector.broadcast %9 : vector<8x1xf32> to vector<8x4624xf32>
    %11 = arith.select %6, %8, %10 : vector<8x4624xi1>, vector<8x4624xf32>
    %c0_5 = arith.constant 0 : index
    %c0_6 = arith.constant 0 : index
    %12 = vector.load %arg4[%c0_5, %c0_6] : memref<8x1xf32, #tpu.memory_space<vmem>>, vector<8x1xf32>
    %c0_7 = arith.constant 0 : index
    %c0_8 = arith.constant 0 : index
    %c0_9 = arith.constant 0 : index
    %13 = vector.load %arg2[%c0_7, %c0_8, %c0_9] : memref<1x1x4624xf32, #tpu.memory_space<vmem>>, vector<1x1x4624xf32>
    %14 = vector.shape_cast %13 : vector<1x1x4624xf32> to vector<1x4624xf32>
    %15 = vector.broadcast %12 : vector<8x1xf32> to vector<8x4624xf32>
    %16 = vector.broadcast %14 : vector<1x4624xf32> to vector<8x4624xf32>
    %17 = arith.mulf %15, %16 : vector<8x4624xf32>
    %18 = arith.addf %17, %11 : vector<8x4624xf32>
    %c0_10 = arith.constant 0 : index
    %c0_11 = arith.constant 0 : index
    %c0_12 = arith.constant 0 : index
    %19 = vector.load %arg7[%c0_10, %c0_11, %c0_12] : memref<1x8x4624xf32, #tpu.memory_space<vmem>>, vector<1x8x4624xf32>
    %20 = vector.shape_cast %19 : vector<1x8x4624xf32> to vector<8x4624xf32>
    %21 = vector.shape_cast %18 : vector<8x4624xf32> to vector<1x8x4624xf32>
    tpu.vector_store %arg7[%c0_10, %c0_11, %c0_12], %21 {strides = array<i32>} : memref<1x8x4624xf32, #tpu.memory_space<vmem>>, vector<1x8x4624xf32>,
    return
  }
  func.func @transform_0(%arg0: i32, %arg1: i32) -> (i32, i32, i32) {
    %c0_i32 = arith.constant 0 : i32
    %c0_i32_0 = arith.constant 0 : i32
    return %arg0, %c0_i32, %arg1 : i32, i32, i32
  }
  func.func @transform_1(%arg0: i32, %arg1: i32) -> (i32, i32) {
    %c0_i32 = arith.constant 0 : i32
    %c0_i32_0 = arith.constant 0 : i32
    return %c0_i32, %arg1 : i32, i32
  }
  func.func @transform_2(%arg0: i32, %arg1: i32) -> (i32, i32) {
    %c0_i32 = arith.constant 0 : i32
    %c0_i32_0 = arith.constant 0 : i32
    %c0_i32_1 = arith.constant 0 : i32
    return %c0_i32, %c0_i32_0 : i32, i32
  }
  func.func @transform_3(%arg0: i32, %arg1: i32) -> (i32, i32) {
    %c0_i32 = arith.constant 0 : i32
    %c0_i32_0 = arith.constant 0 : i32
    %c0_i32_1 = arith.constant 0 : i32
    return %c0_i32, %c0_i32_0 : i32, i32
  }
  func.func @transform_4(%arg0: i32, %arg1: i32) -> (i32, i32) {
    %c0_i32 = arith.constant 0 : i32
    %c0_i32_0 = arith.constant 0 : i32
    %c0_i32_1 = arith.constant 0 : i32
    return %c0_i32, %c0_i32_0 : i32, i32
  }
  func.func @transform_5(%arg0: i32, %arg1: i32) -> (i32, i32, i32) {
    %c0_i32 = arith.constant 0 : i32
    %c0_i32_0 = arith.constant 0 : i32
    return %arg0, %c0_i32, %arg1 : i32, i32, i32
  }
}

</mosaic_0001>

<bundles_post_ra>
// kernel: model_forward.1
= control target key start
LH: loop header
LB: loop body
LE: loop exit
PB: predicated region body
PF: predicated region fallthrough
CT: control target
= control target key end

     0   :  { %v589_v0 = vmov 0   ;;  %v37_v4 = vlaneseq  ;;  %s1643_s2 = inlined_call_operand.vmem [shape: f32[8,1], index: 2, kind: input, shape index: {}]   ;;  %s1644_s4 = inlined_call_operand.vmem [shape: f32[8,1], index: 4, kind: input, shape index: {}]   ;;  %s1645_s3 = inlined_call_operand.vmem [shape: f32[8,1], index: 3, kind: input, shape index: {}]   ;;  %s1646_s1 = inlined_call_operand.vmem [shape: f32[1,4624], index: 1, kind: input, shape index: {}]   ;;  %s1647_s0 = inlined_call_operand.vmem [shape: f32[1,1,4624], index: 0, kind: input, shape index: {}]   ;;  %s1648_s5 = inlined_call_operand.vmem [shape: f32[1,8,4624], index: 5, kind: output, shape index: {}]  }
   0x1   :  { %587 = vset.pattern.permute.xlu0 %v589_v0  ;;  %588 = vset.pattern.permute.xlu1 %v589_v0  ;;  %v269_v1 = vld [vmem:[%s1643_s2] sm:$0xff]  ;;  %v21_v7 = vld [vmem:[%s1646_s1 + $0x8] sm:$0xff]  ;;  %v22_v8 = vld [vmem:[%s1646_s1 + $0x10] sm:$0xff] }
   0x2   :  { %v31_v2 = vld [vmem:[%s1644_s4] sm:$0xff]  ;;  %277 = vperm.xlu0 %587, %v269_v1   ;;  %v38_v6 = vshrl.u32 %v37_v4, 7  ;;  %v23_v9 = vld [vmem:[%s1646_s1 + $0x18] sm:$0xff]  ;;  %vm26_vm1 = vcmp.gt.f32.partialorder %v21_v7, 0.5  ;;  %vm27_vm2 = vcmp.gt.f32.partialorder %v22_v8, 0.5  ;;  %v746_v59 = vld [vmem:[%s1647_s0 + $0x8] sm:$0xff] }
   0x3   :  { %229 = vperm.xlu1 %588, %v31_v2   ;;  %v30_v3 = vld [vmem:[%s1645_s3] sm:$0xff]  ;;  %vm28_vm3 = vcmp.gt.f32.partialorder %v23_v9, 0.5  ;;  %v662_v20 = vsel %vm26_vm1, 1, %v589_v0  ;;  %v664_v21 = vsel %vm27_vm2, 1, %v589_v0  ;;  %v796_v8 = vld [vmem:[%s1647_s0 + $0x18] sm:$0xff] }
   0x4   :  { %v20_v5 = vld [vmem:[%s1646_s1] sm:$0xff]  ;;  %v644_v11 = vsub.s32 0, %v38_v6  ;;  %v646_v12 = vsub.s32 1, %v38_v6  ;;  %v650_v14 = vsub.s32 2, %v38_v6  ;;  %v652_v15 = vsub.s32 3, %v38_v6 }
   0x5   :  { %v24_v10 = vld [vmem:[%s1646_s1 + $0x20] sm:$0x1f]  ;;  %vm25_vm0 = vcmp.gt.f32.partialorder %v20_v5, 0.5  ;;  %v654_v16 = vsub.s32 4, %v38_v6  ;;  %v656_v17 = vsub.s32 5, %v38_v6  ;;  %v658_v18 = vsub.s32 6, %v38_v6 }
   0x6   :  { %224 = vperm.xlu0 %587, %v30_v3   ;;  %vm29_vm4 = vcmp.gt.f32.partialorder %v24_v10, 0.5  ;;  %v648_v13 = vsel %vm25_vm0, 1, %v589_v0  ;;  %v660_v19 = vsub.s32 7, %v38_v6  ;;  %v666_v22 = vsel %vm28_vm3, 1, %v589_v0  ;;  %v725_v50 = vld [vmem:[%s1647_s0] sm:$0xff] }
   0x7   :  { %v668_v23 = vsel %vm29_vm4, 1, %v589_v0  ;;  %v40_v24 = vrot.slane %v648_v13, %v644_v11  ;;  %v44_v25 = vrot.slane %v648_v13, %v646_v12  ;;  %v48_v26 = vrot.slane %v648_v13, %v650_v14  ;;  %v759_v0 = vld [vmem:[%s1647_s0 + $0x10] sm:$0xff] }
   0x8   :  { %v52_v27 = vrot.slane %v648_v13, %v652_v15  ;;  %v56_v28 = vrot.slane %v648_v13, %v654_v16  ;;  %v60_v29 = vrot.slane %v648_v13, %v656_v17  ;;  %v64_v30 = vrot.slane %v648_v13, %v658_v18 }
   0x9   :  { %v68_v31 = vrot.slane %v648_v13, %v660_v19  ;;  %v72_v32 = vrot.slane %v662_v20, %v644_v11  ;;  %v76_v33 = vrot.slane %v662_v20, %v646_v12  ;;  %v80_v34 = vrot.slane %v662_v20, %v650_v14 }
   0xa   :  { %v84_v35 = vrot.slane %v662_v20, %v652_v15  ;;  %v88_v36 = vrot.slane %v662_v20, %v654_v16  ;;  %v92_v37 = vrot.slane %v662_v20, %v656_v17  ;;  %v96_v38 = vrot.slane %v662_v20, %v658_v18 }
   0xb   :  { %v100_v39 = vrot.slane %v662_v20, %v660_v19  ;;  %v104_v40 = vrot.slane %v664_v21, %v644_v11  ;;  %v108_v41 = vrot.slane %v664_v21, %v646_v12  ;;  %v112_v42 = vrot.slane %v664_v21, %v650_v14 }
   0xc   :  { %v116_v43 = vrot.slane %v664_v21, %v652_v15  ;;  %v120_v44 = vrot.slane %v664_v21, %v654_v16  ;;  %v124_v45 = vrot.slane %v664_v21, %v656_v17  ;;  %v128_v46 = vrot.slane %v664_v21, %v658_v18 }
   0xd   :  { %v132_v47 = vrot.slane %v664_v21, %v660_v19  ;;  %v136_v48 = vrot.slane %v666_v22, %v644_v11  ;;  %v140_v49 = vrot.slane %v666_v22, %v646_v12  ;;  %v144_v51 = vrot.slane %v666_v22, %v650_v14 }
   0xe   :  { %v148_v52 = vrot.slane %v666_v22, %v652_v15  ;;  %v152_v53 = vrot.slane %v666_v22, %v654_v16  ;;  %v156_v54 = vrot.slane %v666_v22, %v656_v17  ;;  %v160_v55 = vrot.slane %v666_v22, %v658_v18 }
   0xf   :  { %v164_v56 = vrot.slane %v666_v22, %v660_v19  ;;  %v168_v57 = vrot.slane %v668_v23, %v644_v11  ;;  %v172_v58 = vrot.slane %v668_v23, %v646_v12  ;;  %v176_v60 = vrot.slane %v668_v23, %v650_v14 }
  0x10   :  { %v180_v61 = vrot.slane %v668_v23, %v652_v15  ;;  %v288_v63 = vrot.slane %v725_v50, %v644_v11  ;;  %v292_v1 = vrot.slane %v725_v50, %v646_v12  ;;  %v296_v2 = vrot.slane %v725_v50, %v650_v14 }
  0x11   :  { %v300_v3 = vrot.slane %v725_v50, %v652_v15  ;;  %v304_v4 = vrot.slane %v725_v50, %v654_v16  ;;  %vm777_vm5 = vcmp.eq.s32.totalorder %v40_v24, 1  ;;  %vm781_vm6 = vcmp.eq.s32.totalorder %v44_v25, 1 }
  0x12   :  { %vm785_vm7 = vcmp.eq.s32.totalorder %v48_v26, 1  ;;  %vm789_vm8 = vcmp.eq.s32.totalorder %v52_v27, 1  ;;  %vm806_vm9 = vcmp.eq.s32.totalorder %v56_v28, 1  ;;  %vm810_vm10 = vcmp.eq.s32.totalorder %v60_v29, 1  ;;  %v849_v27 = vld [vmem:[%s1647_s0 + $0x20] sm:$0x1f] }
  0x13   :  { %vm814_vm11 = vcmp.eq.s32.totalorder %v64_v30, 1  ;;  %vm818_vm12 = vcmp.eq.s32.totalorder %v68_v31, 1  ;;  %vm830_vm13 = vcmp.eq.s32.totalorder %v72_v32, 1  ;;  %vm834_vm14 = vcmp.eq.s32.totalorder %v76_v33, 1 }
  0x14   :  { %vm838_vm15 = vcmp.eq.s32.totalorder %v80_v34, 1  ;;  %vm842_vm0 = vcmp.eq.s32.totalorder %v84_v35, 1  ;;  %vm862_vm1 = vcmp.eq.s32.totalorder %v88_v36, 1  ;;  %v1712_v29 = vmov 0 }
  0x15   :  { %v1713_v29 = vsel %vm862_vm1, 4294967295, %v1712_v29  ;;  %vm866_vm2 = vcmp.eq.s32.totalorder %v92_v37, 1  ;;  %v1714_v26 = vmov 0  ;;  %vm870_vm3 = vcmp.eq.s32.totalorder %v96_v38, 1 }
  0x16   :  { %v1715_v26 = vsel %vm866_vm2, 4294967295, %v1714_v26  ;;  %v1716_v32 = vmov 0  ;;  %vm874_vm4 = vcmp.eq.s32.totalorder %v100_v39, 1  ;;  %v1718_v34 = vmov 0 }
  0x17   :  { %v1717_v32 = vsel %vm870_vm3, 4294967295, %v1716_v32  ;;  %v1719_v34 = vsel %vm874_vm4, 4294967295, %v1718_v34  ;;  %vm889_vm3 = vcmp.eq.s32.totalorder %v104_v40, 1  ;;  %v1720_v38 = vmov 0 }
  0x18   :  { %v1721_v38 = vsel %vm889_vm3, 4294967295, %v1720_v38  ;;  %vm896_vm4 = vcmp.eq.s32.totalorder %v108_v41, 1  ;;  %v1722_v39 = vmov 0  ;;  %vm903_vm2 = vcmp.eq.s32.totalorder %v112_v42, 1 }
  0x19   :  { %v1723_v39 = vsel %vm896_vm4, 4294967295, %v1722_v39  ;;  %v1724_v36 = vmov 0  ;;  %vm910_vm1 = vcmp.eq.s32.totalorder %v116_v43, 1  ;;  %v1727_v40 = vmov 0 }
  0x1a   :  { %v1725_v36 = vsel %vm903_vm2, 4294967295, %v1724_v36  ;;  %v1728_v40 = vsel %vm910_vm1, 4294967295, %v1727_v40  ;;  %vm925_vm2 = vcmp.eq.s32.totalorder %v120_v44, 1  ;;  %v1730_v43 = vmov 0 }
  0x1b   :  { %1726 = vst [vmem:[#allocation2_spill] sm:$0xff] %v1725_v36  ;;  %1729 = vst [vmem:[#allocation3_spill] sm:$0xff] %v1728_v40  ;;  %v1731_v43 = vsel %vm925_vm2, 4294967295, %v1730_v43  ;;  %vm932_vm1 = vcmp.eq.s32.totalorder %v124_v45, 1  ;;  %v1733_v41 = vmov 0  ;;  %vm939_vm4 = vcmp.eq.s32.totalorder %v128_v46, 1 }
  0x1c   :  { %1732 = vst [vmem:[#allocation4_spill] sm:$0xff] %v1731_v43  ;;  %v1734_v41 = vsel %vm932_vm1, 4294967295, %v1733_v41  ;;  %v1736_v20 = vmov 0  ;;  %vm946_vm3 = vcmp.eq.s32.totalorder %v132_v47, 1  ;;  %v1739_v44 = vmov 0 }
  0x1d   :  { %1735 = vst [vmem:[#allocation5_spill] sm:$0xff] %v1734_v41  ;;  %v1737_v20 = vsel %vm939_vm4, 4294967295, %v1736_v20  ;;  %v1740_v44 = vsel %vm946_vm3, 4294967295, %v1739_v44  ;;  %vm961_vm4 = vcmp.eq.s32.totalorder %v136_v48, 1  ;;  %v1742_v21 = vmov 0 }
  0x1e   :  { %1738 = vst [vmem:[#allocation6_spill] sm:$0xff] %v1737_v20  ;;  %1741 = vst [vmem:[#allocation7_spill] sm:$0xff] %v1740_v44  ;;  %v1743_v21 = vsel %vm961_vm4, 4294967295, %v1742_v21  ;;  %vm968_vm3 = vcmp.eq.s32.totalorder %v140_v49, 1  ;;  %v1745_v47 = vmov 0  ;;  %vm975_vm1 = vcmp.eq.s32.totalorder %v144_v51, 1 }
  0x1f   :  { %1744 = vst [vmem:[#allocation8_spill] sm:$0xff] %v1743_v21  ;;  %v1746_v47 = vsel %vm968_vm3, 4294967295, %v1745_v47  ;;  %v1748_v37 = vmov 0  ;;  %vm982_vm2 = vcmp.eq.s32.totalorder %v148_v52, 1  ;;  %v1751_v48 = vmov 0 }
  0x20   :  { %1747 = vst [vmem:[#allocation9_spill] sm:$0xff] %v1746_v47  ;;  %v1749_v37 = vsel %vm975_vm1, 4294967295, %v1748_v37  ;;  %v1752_v48 = vsel %vm982_vm2, 4294967295, %v1751_v48  ;;  %vm999_vm1 = vcmp.eq.s32.totalorder %v152_v53, 1  ;;  %v1754_v52 = vmov 0 }
  0x21   :  { %1750 = vst [vmem:[#allocation10_spill] sm:$0xff] %v1749_v37  ;;  %1753 = vst [vmem:[#allocation11_spill] sm:$0xff] %v1752_v48  ;;  %v1755_v52 = vsel %vm999_vm1, 4294967295, %v1754_v52  ;;  %vm1006_vm2 = vcmp.eq.s32.totalorder %v156_v54, 1  ;;  %v1757_v46 = vmov 0  ;;  %vm1013_vm3 = vcmp.eq.s32.totalorder %v160_v55, 1 }
  0x22   :  { %1756 = vst [vmem:[#allocation12_spill] sm:$0xff] %v1755_v52  ;;  %v1758_v46 = vsel %vm1006_vm2, 4294967295, %v1757_v46  ;;  %v1760_v51 = vmov 0  ;;  %vm1020_vm4 = vcmp.eq.s32.totalorder %v164_v56, 1  ;;  %v1763_v53 = vmov 0 }
  0x23   :  { %1759 = vst [vmem:[#allocation13_spill] sm:$0xff] %v1758_v46  ;;  %v1761_v51 = vsel %vm1013_vm3, 4294967295, %v1760_v51  ;;  %v1764_v53 = vsel %vm1020_vm4, 4294967295, %v1763_v53  ;;  %vm1051_vm4 = vcmp.eq.s32.totalorder %v168_v57, 1  ;;  %vm1058_vm3 = vcmp.eq.s32.totalorder %v172_v58, 1 }
  0x24   :  { %1762 = vst [vmem:[#allocation14_spill] sm:$0xff] %v1761_v51  ;;  %1765 = vst [vmem:[#allocation15_spill] sm:$0xff] %v1764_v53  ;;  %vm1065_vm2 = vcmp.eq.s32.totalorder %v176_v60, 1  ;;  %vm1072_vm1 = vcmp.eq.s32.totalorder %v180_v61, 1  ;;  %v1775_v57 = vmov 0  ;;  %v1779_v60 = vrot.slane %v725_v50, %v656_v17 }
  0x25   :  { %v1776_v57 = vsel %vm1072_vm1, 4294967295, %v1775_v57  ;;  %v1781_v61 = vrot.slane %v725_v50, %v658_v18  ;;  %v1783_v35 = vrot.slane %v725_v50, %v660_v19  ;;  %v1822_v24 = vrot.slane %v759_v0, %v644_v11 }
  0x26   :  { %1777 = vst [vmem:[#allocation19_spill] sm:$0xff] %v1776_v57  ;;  %v1829_v51 = vrot.slane %v759_v0, %v660_v19  ;;  %v1834_v37 = vrot.slane %v796_v8, %v654_v16  ;;  %v1835_v47 = vrot.slane %v796_v8, %v656_v17  ;;  %v1836_v21 = vrot.slane %v796_v8, %v658_v18 }
  0x27   :  { %v1837_v44 = vrot.slane %v796_v8, %v660_v19  ;;  %v1838_v20 = vrot.slane %v849_v27, %v644_v11 }
  0x81   :  { %v994_v45 = vpop.permute.xlu0 %277 }
  0x82   :  { %v1028_v54 = vmul.f32 %v288_v63, %v994_v45  ;;  %v1034_v55 = vmul.f32 %v292_v1, %v994_v45  ;;  %v1040_v22 = vmul.f32 %v296_v2, %v994_v45  ;;  %v1046_v56 = vmul.f32 %v300_v3, %v994_v45  ;;  %v1076_v3 = vpop.permute.xlu1 %229 }
  0x83   :  { %v1766_v63 = vmov 0  ;;  %v1769_v1 = vmov 0  ;;  %v1772_v2 = vmov 0  ;;  %v1082_v58 = vmul.f32 %v304_v4, %v994_v45 }
  0x84   :  { %v1767_v63 = vsel %vm1051_vm4, 4294967295, %v1766_v63  ;;  %v1770_v1 = vsel %vm1058_vm3, 4294967295, %v1769_v1  ;;  %v1773_v2 = vsel %vm1065_vm2, 4294967295, %v1772_v2  ;;  %v1088_v42 = vmul.f32 %v1779_v60, %v994_v45 }
  0x85   :  { %1768 = vst [vmem:[#allocation16_spill] sm:$0xff] %v1767_v63  ;;  %1771 = vst [vmem:[#allocation17_spill] sm:$0xff] %v1770_v1  ;;  %v1094_v49 = vmul.f32 %v1781_v61, %v994_v45  ;;  %v1100_v33 = vmul.f32 %v1783_v35, %v994_v45  ;;  %v1785_v4 = vrot.slane %v668_v23, %v654_v16 }
  0x86   :  { %1774 = vst [vmem:[#allocation18_spill] sm:$0xff] %v1773_v2  ;;  %1778 = vst [vmem:[#allocation20_spill] sm:$0xff] %v1082_v58  ;;  %v1786_v58 = vmov 0  ;;  %v1789_v60 = vrot.slane %v746_v59, %v644_v11  ;;  %v1791_v61 = vrot.slane %v746_v59, %v646_v12  ;;  %v1793_v23 = vrot.slane %v746_v59, %v650_v14 }
  0x87   :  { %1780 = vst [vmem:[#allocation21_spill] sm:$0xff] %v1088_v42  ;;  %1782 = vst [vmem:[#allocation22_spill] sm:$0xff] %v1094_v49  ;;  %vm1105_vm1 = vcmp.eq.s32.totalorder %v1785_v4, 1  ;;  %v1795_v4 = vrot.slane %v746_v59, %v652_v15  ;;  %v1823_v2 = vrot.slane %v759_v0, %v646_v12  ;;  %v1826_v1 = vrot.slane %v759_v0, %v654_v16 }
  0x88   :  { %1784 = vst [vmem:[#allocation23_spill] sm:$0xff] %v1100_v33  ;;  %v1787_v58 = vsel %vm1105_vm1, 4294967295, %v1786_v58  ;;  %v1113_v42 = vmul.f32 %v1789_v60, %v994_v45  ;;  %v1119_v50 = vmul.f32 %v1791_v61, %v994_v45  ;;  %v1125_v35 = vmul.f32 %v1793_v23, %v994_v45  ;;  %v1133_v60 = vpop.permute.xlu0 %224 }
  0x89   :  { %1788 = vst [vmem:[#allocation24_spill] sm:$0xff] %v1787_v58  ;;  %v1131_v33 = vmul.f32 %v1795_v4, %v994_v45  ;;  %v236_v9 = vsel %vm806_vm9, %v1133_v60, %v1076_v3  ;;  %v237_v10 = vsel %vm810_vm10, %v1133_v60, %v1076_v3  ;;  %v238_v13 = vsel %vm814_vm11, %v1133_v60, %v1076_v3 }
  0x8a   :  { %1790 = vst [vmem:[#allocation25_spill] sm:$0xff] %v1113_v42  ;;  %1792 = vst [vmem:[#allocation26_spill] sm:$0xff] %v1119_v50  ;;  %v1797_v42 = vrot.slane %v746_v59, %v654_v16  ;;  %v1798_v50 = vrot.slane %v746_v59, %v656_v17  ;;  %v239_v62 = vsel %vm818_vm12, %v1133_v60, %v1076_v3  ;;  %vm1805_vm9 = vnez %v1721_v38 }
  0x8b   :  { %1794 = vst [vmem:[#allocation27_spill] sm:$0xff] %v1125_v35  ;;  %1796 = vst [vmem:[#allocation28_spill] sm:$0xff] %v1131_v33  ;;  %v1799_v35 = vrot.slane %v746_v59, %v658_v18  ;;  %v1800_v33 = vrot.slane %v746_v59, %v660_v19  ;;  %v235_v59 = vsel %vm789_vm8, %v1133_v60, %v1076_v3  ;;  %vm1804_vm8 = vnez %v1719_v34 }
  0x8c   :  { %v1139_v61 = vmul.f32 %v1797_v42, %v994_v45  ;;  %v1145_v23 = vmul.f32 %v1798_v50, %v994_v45  ;;  %v232_v42 = vsel %vm777_vm5, %v1133_v60, %v1076_v3  ;;  %v233_v50 = vsel %vm781_vm6, %v1133_v60, %v1076_v3 }
  0x8d   :  { %v1151_v4 = vmul.f32 %v1799_v35, %v994_v45  ;;  %v1157_v49 = vmul.f32 %v1800_v33, %v994_v45  ;;  %v234_v35 = vsel %vm785_vm7, %v1133_v60, %v1076_v3  ;;  %v240_v7 = vsel %vm830_vm13, %v1133_v60, %v1076_v3 }
  0x8e   :  { %v241_v6 = vsel %vm834_vm14, %v1133_v60, %v1076_v3  ;;  %v242_v5 = vsel %vm838_vm15, %v1133_v60, %v1076_v3  ;;  %v243_v25 = vsel %vm842_vm0, %v1133_v60, %v1076_v3  ;;  %vm1801_vm5 = vnez %v1713_v29  ;;  %v1846_v41 = vld [vmem:[#allocation21_spill] sm:$0xff] }
  0x8f   :  { %v244_v30 = vsel %vm1801_vm5, %v1133_v60, %v1076_v3  ;;  %vm1802_vm6 = vnez %v1715_v26  ;;  %vm1803_vm7 = vnez %v1717_v32  ;;  %vm1806_vm10 = vnez %v1723_v39 }
  0x90   :  { %v245_v31 = vsel %vm1802_vm6, %v1133_v60, %v1076_v3  ;;  %vm1807_vm11 = vnez %v1725_v36  ;;  %vm1808_vm12 = vnez %v1728_v40  ;;  %vm1809_vm13 = vnez %v1731_v43  ;;  %v1848_v43 = vld [vmem:[#allocation23_spill] sm:$0xff] }
  0x91   :  { %vm1816_vm15 = vnez %v1752_v48  ;;  %vm1817_vm0 = vnez %v1755_v52  ;;  %vm1818_vm5 = vnez %v1758_v46  ;;  %vm1820_vm14 = vnez %v1764_v53  ;;  %v1849_v36 = vld [vmem:[#allocation25_spill] sm:$0xff] }
  0x92   :  { %vm1821_vm6 = vnez %v1776_v57  ;;  %v486_v26 = vmul.f32 %v1822_v24, %v994_v45  ;;  %v487_v33 = vmul.f32 %v1823_v2, %v994_v45  ;;  %v1824_v57 = vrot.slane %v759_v0, %v650_v14 }
  0x93   :  { %v1825_v58 = vrot.slane %v759_v0, %v652_v15  ;;  %v490_v24 = vmul.f32 %v1826_v1, %v994_v45  ;;  %v1827_v63 = vrot.slane %v759_v0, %v656_v17  ;;  %v1828_v53 = vrot.slane %v759_v0, %v658_v18 }
  0x94   :  { %v488_v28 = vmul.f32 %v1824_v57, %v994_v45  ;;  %v1830_v46 = vrot.slane %v796_v8, %v644_v11  ;;  %v1831_v52 = vrot.slane %v796_v8, %v646_v12  ;;  %v1832_v48 = vrot.slane %v796_v8, %v650_v14 }
  0x95   :  { %v489_v29 = vmul.f32 %v1825_v58, %v994_v45  ;;  %v491_v2 = vmul.f32 %v1827_v63, %v994_v45  ;;  %v492_v57 = vmul.f32 %v1828_v53, %v994_v45  ;;  %v493_v58 = vmul.f32 %v1829_v51, %v994_v45 }
  0x96   :  { %v494_v1 = vmul.f32 %v1830_v46, %v994_v45  ;;  %v495_v63 = vmul.f32 %v1831_v52, %v994_v45  ;;  %v496_v53 = vmul.f32 %v1832_v48, %v994_v45  ;;  %v1833_v0 = vrot.slane %v796_v8, %v652_v15 }
  0x97   :  { %v498_v46 = vmul.f32 %v1834_v37, %v994_v45  ;;  %v499_v52 = vmul.f32 %v1835_v47, %v994_v45  ;;  %v500_v48 = vmul.f32 %v1836_v21, %v994_v45  ;;  %v502_v37 = vmul.f32 %v1838_v20, %v994_v45 }
  0x98   :  { %v497_v51 = vmul.f32 %v1833_v0, %v994_v45  ;;  %v501_v0 = vmul.f32 %v1837_v44, %v994_v45  ;;  %v1839_v17 = vrot.slane %v849_v27, %v646_v12  ;;  %v1840_v18 = vrot.slane %v849_v27, %v650_v14 }
  0x99   :  { %vm580_vm1 = vcmask 130048   ;;  %v1842_v19 = vrot.slane %v849_v27, %v652_v15  ;;  %v1844_v11 = vrot.slane %v849_v27, %v654_v16  ;;  %v507_v12 = vadd.f32 %v1028_v54, %v232_v42  ;;  %v1850_v27 = vld [vmem:[#allocation26_spill] sm:$0xff]  ;;  %v1851_v54 = vld [vmem:[#allocation27_spill] sm:$0xff] }
  0x9a   :  { %v503_v47 = vmul.f32 %v1839_v17, %v994_v45  ;;  %v1383_v21 = vmul.f32 %v1840_v18, %v994_v45  ;;  %v508_v44 = vadd.f32 %v1034_v55, %v233_v50  ;;  %v509_v14 = vadd.f32 %v1040_v22, %v234_v35  ;;  %v1845_v18 = vld [vmem:[#allocation20_spill] sm:$0xff] }
  0x9b   :  { %v1389_v8 = vmul.f32 %v1842_v19, %v994_v45  ;;  %v1395_v20 = vmul.f32 %v1844_v11, %v994_v45  ;;  %v510_v17 = vadd.f32 %v1046_v56, %v235_v59  ;;  %v512_v15 = vadd.f32 %v1846_v41, %v237_v10  ;;  %v1847_v19 = vld [vmem:[#allocation22_spill] sm:$0xff]  ;;  %544 = vst [vmem:[%s1648_s5] sm:$0xff] %v507_v12  ;;  %v1852_v22 = vld [vmem:[#allocation28_spill] sm:$0xff] }
  0x9c   :  { %1841 = vst [vmem:[#allocation29_spill] sm:$0xff] %v1383_v21  ;;  %v511_v21 = vadd.f32 %v1845_v18, %v236_v9  ;;  %v514_v40 = vadd.f32 %v1848_v43, %v239_v62  ;;  %v515_v16 = vadd.f32 %v1849_v36, %v240_v7  ;;  %v516_v45 = vadd.f32 %v1850_v27, %v241_v6  ;;  %v1863_v62 = vld [vmem:[#allocation5_spill] sm:$0xff] }
  0x9d   :  { %1843 = vst [vmem:[#allocation30_spill] sm:$0xff] %v1389_v8  ;;  %v513_v8 = vadd.f32 %v1847_v19, %v238_v13  ;;  %545 = vst [vmem:[%s1648_s5 + $0x8] sm:$0xff] %v508_v44  ;;  %v517_v55 = vadd.f32 %v1851_v54, %v242_v5  ;;  %v518_v41 = vadd.f32 %v1852_v22, %v243_v25  ;;  %v1866_v5 = vld [vmem:[#allocation6_spill] sm:$0xff] }
  0x9e   :  { %v519_v56 = vadd.f32 %v1139_v61, %v244_v30  ;;  %v520_v43 = vadd.f32 %v1145_v23, %v245_v31  ;;  %546 = vst [vmem:[%s1648_s5 + $0x10] sm:$0xff] %v509_v14  ;;  %547 = vst [vmem:[%s1648_s5 + $0x18] sm:$0xff] %v510_v17  ;;  %v1853_v36 = vsel %vm1803_vm7, %v1133_v60, %v1076_v3  ;;  %vm1864_vm7 = vnez %v1863_v62  ;;  %v1869_v31 = vld [vmem:[#allocation7_spill] sm:$0xff] }
  0x9f   :  { %548 = vst [vmem:[%s1648_s5 + $0x20] sm:$0xff] %v511_v21  ;;  %549 = vst [vmem:[%s1648_s5 + $0x28] sm:$0xff] %v512_v15  ;;  %v521_v61 = vadd.f32 %v1151_v4, %v1853_v36  ;;  %v1854_v23 = vsel %vm1804_vm8, %v1133_v60, %v1076_v3  ;;  %v1855_v50 = vsel %vm1805_vm9, %v1133_v60, %v1076_v3  ;;  %vm1867_vm8 = vnez %v1866_v5 }
  0xa0   :  { %v522_v42 = vadd.f32 %v1157_v49, %v1854_v23  ;;  %v523_v35 = vadd.f32 %v486_v26, %v1855_v50  ;;  %v1856_v32 = vsel %vm1806_vm10, %v1133_v60, %v1076_v3  ;;  %550 = vst [vmem:[%s1648_s5 + $0x30] sm:$0xff] %v513_v8  ;;  %551 = vst [vmem:[%s1648_s5 + $0x38] sm:$0xff] %v514_v40  ;;  %vm1870_vm9 = vnez %v1869_v31  ;;  %v1872_v26 = vld [vmem:[#allocation8_spill] sm:$0xff] }
  0xa1   :  { %v524_v59 = vadd.f32 %v487_v33, %v1856_v32  ;;  %552 = vst [vmem:[%s1648_s5 + $0x40] sm:$0xff] %v515_v16  ;;  %553 = vst [vmem:[%s1648_s5 + $0x48] sm:$0xff] %v516_v45  ;;  %v1858_v38 = vsel %vm1807_vm11, %v1133_v60, %v1076_v3  ;;  %v1860_v4 = vsel %vm1808_vm12, %v1133_v60, %v1076_v3  ;;  %vm1873_vm10 = vnez %v1872_v26 }
  0xa2   :  { %v525_v39 = vadd.f32 %v488_v28, %v1858_v38  ;;  %v526_v40 = vadd.f32 %v489_v29, %v1860_v4  ;;  %v1862_v10 = vsel %vm1809_vm13, %v1133_v60, %v1076_v3  ;;  %v1865_v7 = vsel %vm1864_vm7, %v1133_v60, %v1076_v3  ;;  %554 = vst [vmem:[%s1648_s5 + $0x50] sm:$0xff] %v517_v55 }
  0xa3   :  { %v527_v13 = vadd.f32 %v490_v24, %v1862_v10  ;;  %v528_v6 = vadd.f32 %v491_v2, %v1865_v7  ;;  %555 = vst [vmem:[%s1648_s5 + $0x58] sm:$0xff] %v518_v41  ;;  %556 = vst [vmem:[%s1648_s5 + $0x60] sm:$0xff] %v519_v56  ;;  %v1868_v25 = vsel %vm1867_vm8, %v1133_v60, %v1076_v3  ;;  %v1875_v2 = vld [vmem:[#allocation9_spill] sm:$0xff] }
  0xa4   :  { %557 = vst [vmem:[%s1648_s5 + $0x68] sm:$0xff] %v520_v43  ;;  %v529_v30 = vadd.f32 %v492_v57, %v1868_v25  ;;  %v1871_v28 = vsel %vm1870_vm9, %v1133_v60, %v1076_v3  ;;  %v1874_v33 = vsel %vm1873_vm10, %v1133_v60, %v1076_v3  ;;  %vm1876_vm11 = vnez %v1875_v2  ;;  %558 = vst [vmem:[%s1648_s5 + $0x70] sm:$0xff] %v521_v61  ;;  %v1878_v57 = vld [vmem:[#allocation10_spill] sm:$0xff] }
  0xa5   :  { %v530_v29 = vadd.f32 %v493_v58, %v1871_v28  ;;  %v531_v24 = vadd.f32 %v494_v1, %v1874_v33  ;;  %v1877_v21 = vsel %vm1876_vm11, %v1133_v60, %v1076_v3  ;;  %559 = vst [vmem:[%s1648_s5 + $0x78] sm:$0xff] %v522_v42  ;;  %560 = vst [vmem:[%s1648_s5 + $0x80] sm:$0xff] %v523_v35  ;;  %vm1879_vm12 = vnez %v1878_v57  ;;  %v1901_v61 = vld [vmem:[#allocation30_spill] sm:$0xff]  ;;  %v1902_v42 = vld [vmem:[#allocation24_spill] sm:$0xff] }
  0xa6   :  { %v532_v8 = vadd.f32 %v495_v63, %v1877_v21  ;;  %561 = vst [vmem:[%s1648_s5 + $0x88] sm:$0xff] %v524_v59  ;;  %v1880_v58 = vsel %vm1879_vm12, %v1133_v60, %v1076_v3  ;;  %v1882_v11 = vsel %vm1816_vm15, %v1133_v60, %v1076_v3  ;;  %v1884_v14 = vsel %vm1817_vm0, %v1133_v60, %v1076_v3 }
  0xa7   :  { %v533_v1 = vadd.f32 %v496_v53, %v1880_v58  ;;  %v534_v12 = vadd.f32 %v497_v51, %v1882_v11  ;;  %v535_v17 = vadd.f32 %v498_v46, %v1884_v14  ;;  %v1886_v15 = vsel %vm1818_vm5, %v1133_v60, %v1076_v3  ;;  %562 = vst [vmem:[%s1648_s5 + $0x90] sm:$0xff] %v525_v39  ;;  %v1887_v53 = vld [vmem:[#allocation14_spill] sm:$0xff] }
  0xa8   :  { %v536_v19 = vadd.f32 %v499_v52, %v1886_v15  ;;  %563 = vst [vmem:[%s1648_s5 + $0x98] sm:$0xff] %v526_v40  ;;  %564 = vst [vmem:[%s1648_s5 + $0xa0] sm:$0xff] %v527_v13  ;;  %vm1888_vm13 = vnez %v1887_v53  ;;  %v1891_v16 = vsel %vm1820_vm14, %v1133_v60, %v1076_v3  ;;  %v1893_v54 = vsel %vm1051_vm4, %v1133_v60, %v1076_v3 }
  0xa9   :  { %565 = vst [vmem:[%s1648_s5 + $0xa8] sm:$0xff] %v528_v6  ;;  %v1889_v51 = vsel %vm1888_vm13, %v1133_v60, %v1076_v3  ;;  %v538_v27 = vadd.f32 %v501_v0, %v1891_v16  ;;  %v539_v55 = vadd.f32 %v502_v37, %v1893_v54  ;;  %v1895_v41 = vsel %vm1058_vm3, %v1133_v60, %v1076_v3  ;;  %v1898_v37 = vld [vmem:[#allocation29_spill] sm:$0xff] }
  0xaa   :  { %v537_v46 = vadd.f32 %v500_v48, %v1889_v51  ;;  %v540_v56 = vadd.f32 %v503_v47, %v1895_v41  ;;  %566 = vst [vmem:[%s1648_s5 + $0xb0] sm:$0xff] %v529_v30  ;;  %567 = vst [vmem:[%s1648_s5 + $0xb8] sm:$0xff] %v530_v29  ;;  %v1897_v0 = vsel %vm1065_vm2, %v1133_v60, %v1076_v3  ;;  %vm1903_vm3 = vnez %v1902_v42 }
  0xab   :  { %568 = vst [vmem:[%s1648_s5 + $0xc0] sm:$0xff] %v531_v24  ;;  %569 = vst [vmem:[%s1648_s5 + $0xc8] sm:$0xff] %v532_v8  ;;  %v541_v47 = vadd.f32 %v1898_v37, %v1897_v0  ;;  %v1900_v36 = vsel %vm1821_vm6, %v1133_v60, %v1076_v3  ;;  %v1904_v50 = vsel %vm1903_vm3, %v1133_v60, %v1076_v3 }
  0xac   :  { %v542_v23 = vadd.f32 %v1901_v61, %v1900_v36  ;;  %v543_v35 = vadd.f32 %v1395_v20, %v1904_v50  ;;  %570 = vst [vmem:[%s1648_s5 + $0xd0] sm:$0xff] %v533_v1  ;;  %571 = vst [vmem:[%s1648_s5 + $0xd8] sm:$0xff] %v534_v12 }
  0xad   :  { %572 = vst [vmem:[%s1648_s5 + $0xe0] sm:$0xff] %v535_v17  ;;  %573 = vst [vmem:[%s1648_s5 + $0xe8] sm:$0xff] %v536_v19 }
  0xae   :  { %574 = vst [vmem:[%s1648_s5 + $0xf0] sm:$0xff] %v537_v46  ;;  %575 = vst [vmem:[%s1648_s5 + $0xf8] sm:$0xff] %v538_v27 }
  0xaf   :  { %576 = vst [vmem:[%s1648_s5 + $0x100] sm:$0xff] %v539_v55  ;;  %577 = vst [vmem:[%s1648_s5 + $0x108] sm:$0xff] %v540_v56 }
  0xb0   :  { %578 = vst [vmem:[%s1648_s5 + $0x110] sm:$0xff] %v541_v47  ;;  %579 = vst [vmem:[%s1648_s5 + $0x118] sm:$0xff] %v542_v23 }
  0xb1   :  { %581 = vst.msk [vmem:[%s1648_s5 + $0x120] sm:$0xff] %vm580_vm1, %v543_v35 }

</bundles_post_ra>
